<compile_context>
chip_gen: v6e
topology: v6e:2x2x1
jax: 0.10.0
libtpu: 0.0.40
codegen_flags: <defaults>
</compile_context>

<pallas_src>
import jax
import jax.numpy as jnp
from jax.experimental import pallas as pl
from jax.experimental.pallas import tpu as pltpu


def se_kernel(x_ref, w1t_ref, w2t_ref, b1_ref, b2_ref, o_ref):
    # x_ref / o_ref: (nb, C, H*W) in the input's native dtype.

    # Pass 1: global average pool (raw sum; 1/HW is folded into w1t).
    # Short-lived read of the slab.
    pooled = jnp.sum(x_ref[...], axis=-1, dtype=jnp.float32)          # (nb, C)

    # 1x1 Conv2d(C -> Cr) with BN1 scale (and 1/HW) folded; bias; ReLU.
    h = jnp.maximum(
        jnp.dot(pooled, w1t_ref[...], preferred_element_type=jnp.float32)
        + b1_ref[...],
        0.0,
    )                                                                  # (nb, Cr)

    # 1x1 Conv2d(Cr -> C) with BN2 scale folded; bias.
    y = jnp.dot(h, w2t_ref[...], preferred_element_type=jnp.float32) + b2_ref[...]

    # hsigmoid: relu6(y + 3) / 6
    gate = jnp.clip(y + 3.0, 0.0, 6.0) * (1.0 / 6.0)                   # (nb, C) f32

    # Pass 2: re-read x, multiply by the broadcast gate (f32), cast once at the
    # store.  Lane-dense, unmasked store over the flattened spatial dim.
    o_ref[...] = (x_ref[...] * gate[:, :, None]).astype(o_ref.dtype)


def _choose_nb(n, per_n_bytes, slab_budget_bytes=3 << 20, slab_floor_bytes=512 << 10):
    """Pick batches-per-grid-step.

    Prefer many small, evenly-split steps (v7x shards the 'parallel' grid axis
    across its 2 TensorCores; ~1-4 MiB slabs already reach the HBM roofline)
    while keeping the per-step slab above a floor so the ~0.35 us per-step
    overhead stays negligible.
    """
    divisors = [d for d in range(1, n + 1) if n % d == 0]
    fitting = [d for d in divisors if d * per_n_bytes <= slab_budget_bytes] or [1]
    floor_ok = [d for d in fitting if d * per_n_bytes >= slab_floor_bytes]
    cands = floor_ok if floor_ok else [max(fitting)]
    # Most steps (smallest nb); prefer an even step count for core balance.
    even = [d for d in cands if (n // d) % 2 == 0]
    return min(even) if even else min(cands)


def se_module(x, w1, w2, s1, b1, s2, b2):
    """x: (N, C, H, W); w1: (Cr, C); w2: (C, Cr); s*/b*: folded BN scale/bias (1D)."""
    N, C, H, W = x.shape
    Cr = w1.shape[0]
    HW = H * W

    # Fold BN scales and the 1/HW pooling normalizer into the conv weights and
    # pre-transpose (wrapper-side layout/constant plumbing, zero kernel cost).
    w1t = ((w1 * s1.reshape(Cr, 1)).T * (1.0 / HW)).astype(jnp.float32)  # (C, Cr)
    w2t = (w2 * s2.reshape(C, 1)).T.astype(jnp.float32)                  # (Cr, C)
    b1r = b1.reshape(1, Cr).astype(jnp.float32)
    b2r = b2.reshape(1, C).astype(jnp.float32)

    # Lane-dense layout: flatten spatial dims so the last dim is H*W.
    x_flat = x.reshape(N, C, HW)

    per_n_bytes = C * HW * x.dtype.itemsize
    nb = _choose_nb(N, per_n_bytes)
    slab_bytes = nb * per_n_bytes

    # Explicit VMEM budget: input + output slabs double-buffered, plus room for
    # the f32 product temp at the store, weights/biases and margin.  Capped
    # well under v7x's 64 MiB physical VMEM; always above v5e's 16 MiB default
    # scoped limit concerns because it is set explicitly.
    weights_bytes = (2 * C * Cr + Cr + C) * 4
    vmem_limit = int(min(6 * slab_bytes + 2 * weights_bytes + (2 << 20), 48 << 20))

    cost = pl.CostEstimate(
        flops=int(4 * N * C * Cr),
        transcendentals=0,
        bytes_accessed=int(2 * N * C * HW * x.dtype.itemsize + weights_bytes),
    )

    out_flat = pl.pallas_call(
        se_kernel,
        out_shape=jax.ShapeDtypeStruct((N, C, HW), x.dtype),
        grid=(N // nb,),
        in_specs=[
            pl.BlockSpec((nb, C, HW), lambda n: (n, 0, 0)),   # x: nb batches per step
            pl.BlockSpec((C, Cr), lambda n: (0, 0)),          # W1^T (BN1 scale, 1/HW folded)
            pl.BlockSpec((Cr, C), lambda n: (0, 0)),          # W2^T (BN2 scale folded)
            pl.BlockSpec((1, Cr), lambda n: (0, 0)),          # BN1 bias
            pl.BlockSpec((1, C), lambda n: (0, 0)),           # BN2 bias
        ],
        out_specs=pl.BlockSpec((nb, C, HW), lambda n: (n, 0, 0)),
        compiler_params=pltpu.CompilerParams(
            dimension_semantics=("parallel",),
            vmem_limit_bytes=vmem_limit,
        ),
        cost_estimate=cost,
    )(x_flat, w1t, w2t, b1r, b2r)

    return out_flat.reshape(N, C, H, W)


def fold_bn(gamma, beta, mean, var, eps=1e-5):
    scale = gamma / jnp.sqrt(var + eps)
    bias = beta - mean * scale
    return scale, bias


def reference(x, w1, w2, s1, b1, s2, b2):
    pooled = jnp.mean(x, axis=(2, 3))                      # (N, C)
    h = jnp.maximum(pooled @ w1.T * s1 + b1, 0.0)          # (N, Cr)
    y = h @ w2.T * s2 + b2                                 # (N, C)
    gate = jnp.clip(y + 3.0, 0.0, 6.0) / 6.0
    return x * gate[:, :, None, None]


if __name__ == "__main__":
    N, C, H, W = 2, 4, 16, 16
    reduction = 4
    Cr = C // reduction

    key = jax.random.PRNGKey(0)
    k = jax.random.split(key, 12)

    x = jax.random.normal(k[0], (N, C, H, W), dtype=jnp.float32)

    # Conv weights (kernel_size=1, bias=False): (out_ch, in_ch)
    w1 = jax.random.normal(k[1], (Cr, C), dtype=jnp.float32) * 0.5
    w2 = jax.random.normal(k[2], (C, Cr), dtype=jnp.float32) * 0.5

    # BatchNorm params (inference: running stats), deterministic but non-trivial.
    g1 = 1.0 + 0.1 * jax.random.normal(k[3], (Cr,), dtype=jnp.float32)
    be1 = 0.1 * jax.random.normal(k[4], (Cr,), dtype=jnp.float32)
    m1 = 0.1 * jax.random.normal(k[5], (Cr,), dtype=jnp.float32)
    v1 = 1.0 + 0.1 * jnp.abs(jax.random.normal(k[6], (Cr,), dtype=jnp.float32))

    g2 = 1.0 + 0.1 * jax.random.normal(k[7], (C,), dtype=jnp.float32)
    be2 = 0.1 * jax.random.normal(k[8], (C,), dtype=jnp.float32)
    m2 = 0.1 * jax.random.normal(k[9], (C,), dtype=jnp.float32)
    v2 = 1.0 + 0.1 * jnp.abs(jax.random.normal(k[10], (C,), dtype=jnp.float32))

    s1, b1 = fold_bn(g1, be1, m1, v1)
    s2, b2 = fold_bn(g2, be2, m2, v2)

    out = se_module(x, w1, w2, s1, b1, s2, b2)
    out = jax.block_until_ready(out)

    ref = reference(x, w1, w2, s1, b1, s2, b2)
    assert out.shape == x.shape and out.dtype == x.dtype
    assert jnp.allclose(out, ref, atol=1e-5, rtol=1e-5), "mismatch vs reference"

    print("KERNEL_OK")
</pallas_src>

<mosaic_0001>
module attributes {stable_mosaic.version = 11 : i64} {
  func.func @se_kernel(%arg0: i32, %arg1: memref<2x4x256xf32, #tpu.memory_space<vmem>>, %arg2: memref<4x1xf32, #tpu.memory_space<vmem>>, %arg3: memref<1x4xf32, #tpu.memory_space<vmem>>, %arg4: memref<1x1xf32, #tpu.memory_space<vmem>>, %arg5: memref<1x4xf32, #tpu.memory_space<vmem>>, %arg6: memref<2x4x256xf32, #tpu.memory_space<vmem>>) attributes {dimension_semantics = [#tpu.dimension_semantics<parallel>], iteration_bounds = array<i64: 1>, scalar_prefetch = 0 : i64, scratch_operands = 0 : i64, tpu.core_type = #tpu.core_type<tc>, window_params = [{transform_indices = @transform_0, window_bounds = array<i64: 2, 4, 256>}, {pipeline_mode = #tpu.pipeline_mode<synchronous>, transform_indices = @transform_1, window_bounds = array<i64: 4, 1>}, {pipeline_mode = #tpu.pipeline_mode<synchronous>, transform_indices = @transform_2, window_bounds = array<i64: 1, 4>}, {pipeline_mode = #tpu.pipeline_mode<synchronous>, transform_indices = @transform_3, window_bounds = array<i64: 1, 1>}, {pipeline_mode = #tpu.pipeline_mode<synchronous>, transform_indices = @transform_4, window_bounds = array<i64: 1, 4>}, {transform_indices = @transform_5, window_bounds = array<i64: 2, 4, 256>}]} {
    %c0 = arith.constant 0 : index
    %c0_0 = arith.constant 0 : index
    %c0_1 = arith.constant 0 : index
    %0 = vector.load %arg1[%c0, %c0_0, %c0_1] : memref<2x4x256xf32, #tpu.memory_space<vmem>>, vector<2x4x256xf32>
    %cst = arith.constant dense<0.000000e+00> : vector<2x4xf32>
    %1 = vector.multi_reduction <add>, %0, %cst [2] : vector<2x4x256xf32> to vector<2x4xf32>
    %c0_2 = arith.constant 0 : index
    %c0_3 = arith.constant 0 : index
    %2 = vector.load %arg2[%c0_2, %c0_3] : memref<4x1xf32, #tpu.memory_space<vmem>>, vector<4x1xf32>
    %cst_4 = arith.constant dense<0.000000e+00> : vector<2x1xf32>
    %3 = tpu.matmul %1, %2, %cst_4 {dimension_numbers = #tpu.dot_dimension_numbers<[1], [0], [0], [1], [0, 0, 1, 1], [], []>} : vector<2x4xf32>, vector<4x1xf32>, vector<2x1xf32> -> vector<2x1xf32>
    %c0_5 = arith.constant 0 : index
    %c0_6 = arith.constant 0 : index
    %4 = vector.load %arg4[%c0_5, %c0_6] : memref<1x1xf32, #tpu.memory_space<vmem>>, vector<1x1xf32>
    %5 = vector.broadcast %4 : vector<1x1xf32> to vector<2x1xf32>
    %6 = arith.addf %3, %5 : vector<2x1xf32>
    %cst_7 = arith.constant 0.000000e+00 : f32
    %7 = vector.broadcast %cst_7 : f32 to vector<2x1xf32>
    %8 = arith.maximumf %6, %7 : vector<2x1xf32>
    %c0_8 = arith.constant 0 : index
    %c0_9 = arith.constant 0 : index
    %9 = vector.load %arg3[%c0_8, %c0_9] : memref<1x4xf32, #tpu.memory_space<vmem>>, vector<1x4xf32>
    %cst_10 = arith.constant dense<0.000000e+00> : vector<2x4xf32>
    %10 = tpu.matmul %8, %9, %cst_10 {dimension_numbers = #tpu.dot_dimension_numbers<[1], [0], [0], [1], [0, 0, 1, 1], [], []>} : vector<2x1xf32>, vector<1x4xf32>, vector<2x4xf32> -> vector<2x4xf32>
    %c0_11 = arith.constant 0 : index
    %c0_12 = arith.constant 0 : index
    %11 = vector.load %arg5[%c0_11, %c0_12] : memref<1x4xf32, #tpu.memory_space<vmem>>, vector<1x4xf32>
    %12 = vector.broadcast %11 : vector<1x4xf32> to vector<2x4xf32>
    %13 = arith.addf %10, %12 : vector<2x4xf32>
    %cst_13 = arith.constant 3.000000e+00 : f32
    %14 = vector.broadcast %cst_13 : f32 to vector<2x4xf32>
    %15 = arith.addf %13, %14 : vector<2x4xf32>
    %cst_14 = arith.constant 0.000000e+00 : f32
    %cst_15 = arith.constant 6.000000e+00 : f32
    %16 = vector.broadcast %cst_14 : f32 to vector<2x4xf32>
    %17 = arith.maximumf %16, %15 : vector<2x4xf32>
    %18 = vector.broadcast %cst_15 : f32 to vector<2x4xf32>
    %19 = arith.minimumf %18, %17 : vector<2x4xf32>
    %cst_16 = arith.constant 0.166666672 : f32
    %20 = vector.broadcast %cst_16 : f32 to vector<2x4xf32>
    %21 = arith.mulf %19, %20 : vector<2x4xf32>
    %c0_17 = arith.constant 0 : index
    %c0_18 = arith.constant 0 : index
    %c0_19 = arith.constant 0 : index
    %22 = vector.load %arg1[%c0_17, %c0_18, %c0_19] : memref<2x4x256xf32, #tpu.memory_space<vmem>>, vector<2x4x256xf32>
    %23 = vector.shape_cast %21 : vector<2x4xf32> to vector<2x4x1xf32>
    %24 = vector.broadcast %23 : vector<2x4x1xf32> to vector<2x4x256xf32>
    %25 = arith.mulf %22, %24 : vector<2x4x256xf32>
    %c0_20 = arith.constant 0 : index
    %c0_21 = arith.constant 0 : index
    %c0_22 = arith.constant 0 : index
    %26 = vector.load %arg6[%c0_20, %c0_21, %c0_22] : memref<2x4x256xf32, #tpu.memory_space<vmem>>, vector<2x4x256xf32>
    tpu.vector_store %arg6[%c0_20, %c0_21, %c0_22], %25 {strides = array<i32>} : memref<2x4x256xf32, #tpu.memory_space<vmem>>, vector<2x4x256xf32>,
    return
  }
  func.func @transform_0(%arg0: i32) -> (i32, i32, i32) {
    %c0_i32 = arith.constant 0 : i32
    %c0_i32_0 = arith.constant 0 : i32
    %c0_i32_1 = arith.constant 0 : i32
    return %arg0, %c0_i32, %c0_i32_0 : i32, i32, i32
  }
  func.func @transform_1(%arg0: i32) -> (i32, i32) {
    %c0_i32 = arith.constant 0 : i32
    %c0_i32_0 = arith.constant 0 : i32
    %c0_i32_1 = arith.constant 0 : i32
    return %c0_i32, %c0_i32_0 : i32, i32
  }
  func.func @transform_2(%arg0: i32) -> (i32, i32) {
    %c0_i32 = arith.constant 0 : i32
    %c0_i32_0 = arith.constant 0 : i32
    %c0_i32_1 = arith.constant 0 : i32
    return %c0_i32, %c0_i32_0 : i32, i32
  }
  func.func @transform_3(%arg0: i32) -> (i32, i32) {
    %c0_i32 = arith.constant 0 : i32
    %c0_i32_0 = arith.constant 0 : i32
    %c0_i32_1 = arith.constant 0 : i32
    return %c0_i32, %c0_i32_0 : i32, i32
  }
  func.func @transform_4(%arg0: i32) -> (i32, i32) {
    %c0_i32 = arith.constant 0 : i32
    %c0_i32_0 = arith.constant 0 : i32
    %c0_i32_1 = arith.constant 0 : i32
    return %c0_i32, %c0_i32_0 : i32, i32
  }
  func.func @transform_5(%arg0: i32) -> (i32, i32, i32) {
    %c0_i32 = arith.constant 0 : i32
    %c0_i32_0 = arith.constant 0 : i32
    %c0_i32_1 = arith.constant 0 : i32
    return %arg0, %c0_i32, %c0_i32_0 : i32, i32, i32
  }
}

</mosaic_0001>

<bundles_post_ra>
// kernel: tpu_custom_call.1
= control target key start
LH: loop header
LB: loop body
LE: loop exit
PB: predicated region body
PF: predicated region fallthrough
CT: control target
= control target key end

     0   :  { %s443_s0 = inlined_call_operand.hbm [shape: f32[2,4,256], index: 0, kind: input, shape index: {}]   ;;  %s444_s1 = inlined_call_operand.vmem [shape: f32[4,1], index: 1, kind: input, shape index: {}]   ;;  %s445_s2 = inlined_call_operand.vmem [shape: f32[1,4], index: 2, kind: input, shape index: {}]   ;;  %s446_s3 = inlined_call_operand.<no memory space> [shape: f32[1,1], index: 3, kind: input, shape index: {}]   ;;  %s447_s4 = inlined_call_operand.vmem [shape: f32[1,4], index: 4, kind: input, shape index: {}]   ;;  %s448_s5 = inlined_call_operand.hbm [shape: f32[2,4,256], index: 5, kind: output, shape index: {}]  }
   0x1   :  { %v10_v0 = vstv %s446_s3 }
   0x2   :  { %11 = vst [vmem:[#allocation2] sm:$0x1] %v10_v0 }
   0x3   :  { %12 = vsyncpa [#allocation4], 0 }
   0x4   :  { %13 = vsyncpa [#allocation5], 0  ;;  %s371_s20 = smov [#allocation3]  }
   0x5   :  { %s19_s21 = sshll.u32 %s371_s20, 4  ;;  %s20_s21 = int_to_ptr.vmem [resolvable:$true] %s19_s21 }
   0x6   :  { %s335_s22 = scalar_lea.vmem %s20_s21, 256  ;;  %p340_p1 = scmp.lt.s32.totalorder %s20_s21, %s20_s21 }
   0x7   :  { %p336_p0 = scmp.ne.s32.totalorder %s20_s21, %s335_s22  ;;  %p341_p2 = scmp.lt.s32.totalorder %s335_s22, %s335_s22 }
   0x9   :  { %p342_p3 = por %p341_p2, %p340_p1 }
   0xb   :  { %p343_p4 = pnand %p342_p3, %p336_p0 }
   0xd   :  { %346 = shalt.err (!%p343_p4)
}
   0xe   :  { %s372_s23 = smov 128   ;;  %s373_s24 = smov 8  }
   0xf   :  { %25 = dma.hbm_to_vmem [thread:$0]  %s443_s0, 256, %s20_s21, [#allocation4], %s372_s23, %s372_s23, %s373_s24  }
  0x10   :  { %367 = dma.done.wait [#allocation4], 256  }
  0x11   :  { %368 = vsyncadd [#allocation4], 4294967040  ;;  %vm45_vm0 = vcmask 1043456   ;;  %v37_v1 = vld [vmem:[#allocation3] sm:$0xff]  ;;  %v417_v2 = vld [vmem:[#allocation3 + $0x8] sm:$0xff]  ;;  %v374_v12 = vmov 0.0   ;;  %v66_v13 = vlaneseq }
  0x12   :  { %v41_v3 = vcombine.high %v37_v1, %v37_v1  ;;  %v46_v4 = vsel %vm45_vm0, %v37_v1, 0.0  ;;  %v42_v5 = vcombine.high %v417_v2, %v417_v2  ;;  %v51_v7 = vsel %vm45_vm0, %v417_v2, 0.0  ;;  %v56_v11 = vld [vmem:[%s444_s1] sm:$0xf]  ;;  %308 = vmatprep.subr.mxu0 %v374_v12  ;;  %313 = vmatprep.subr.mxu1 %v374_v12 }
  0x13   :  { %vm375_vm1 = vmmov 0   ;;  %309 = vmatpush3.msk.msra.mxu0 %vm45_vm0, %v56_v11  ;;  %v67_v14 = vand.u32 127, %v66_v13  ;;  %v69_v15 = vshrl.u32 %v66_v13, 7  ;;  %vm76_vm2 = vcmask 1041409   ;;  %v155_v22 = vld [vmem:[%s445_s2] sm:$0x1] }
  0x14   :  { %v47_v6 = vsel %vm45_vm0, %v41_v3, 0.0  ;;  %v52_v8 = vsel %vm45_vm0, %v42_v5, 0.0  ;;  %310 = vmatprep.mubr.msk.f32.mxu0 %vm375_vm1, %v374_v12  ;;  %315 = vmatprep.mubr.msk.f32.mxu1 %vm375_vm1, %v374_v12  ;;  %vm78_vm3 = vcmask 31744   ;;  %vm167_vm4 = vcmask 1040384   ;;  %v298_v23 = vld [vmem:[#allocation2] ss:$0 sm:$0xff] }
  0x15   :  { %v48_v9 = vadd.f32 %v47_v6, %v46_v4  ;;  %v53_v10 = vadd.f32 %v52_v8, %v51_v7  ;;  %v70_v17 = vsub.s32 %v67_v14, %v69_v15  ;;  %314 = vmatpush3.msk.msra.mxu1 %vm167_vm4, %v155_v22  ;;  %vm163_vm5 = vcmask 7168   ;;  %v301_v28 = vld [vmem:[%s447_s4] ss:$0 sm:$0xff]  ;;  %s377_s2 = smov [#allocation6]  }
  0x16   :  { %v247_v35 = vsub.s32 0, %v69_v15  ;;  %v254_v38 = vsub.s32 1, %v69_v15  ;;  %v376_v40 = vmov 839922192   ;;  %s286_s4 = sshll.u32 %s377_s2, 4  ;;  %s287_s4 = int_to_ptr.vmem [resolvable:$true] %s286_s4 }
  0x17   :  { %49 = vadd.xlane.f32.xlu0 %v48_v9  ;;  %v262_v41 = vunpack.c.l.s4 %v376_v40  ;;  %s347_s30 = scalar_lea.vmem %s287_s4, 256  ;;  %p352_p6 = scmp.lt.s32.totalorder %s287_s4, %s287_s4 }
  0x18   :  { %p348_p5 = scmp.ne.s32.totalorder %s287_s4, %s347_s30  ;;  %p353_p7 = scmp.lt.s32.totalorder %s347_s30, %s347_s30 }
  0x19   :  { %v263_v42 = vunpack.c.0.s8 %v262_v41 }
  0x1a   :  { %p354_p8 = por %p353_p7, %p352_p6 }
  0x1b   :  { %54 = vadd.xlane.f32.xlu0 %v53_v10  ;;  %v266_v43 = vsub.s32 %v263_v42, %v69_v15 }
  0x1c   :  { %p355_p9 = pnand %p354_p8, %p348_p5 }
  0xa0   :  { %v50_v16 = vpop.xlane.xlu0 %49 }
  0xa1   :  { %v71_v19 = vrot.slane %v50_v16, %v70_v17 }
  0xa4   :  { %v55_v18 = vpop.xlane.xlu0 %54 }
  0xa5   :  { %v75_v20 = vrot.slane %v55_v18, %v70_v17 }
  0xa7   :  { %v77_v21 = vsel %vm76_vm2, %v75_v20, %v71_v19 }
  0xa8   :  { %311 = vmatmul.mubr.msk.f32.vlgmr.msra.gmra.mxu0 %vm78_vm3, %v77_v21 }
 0x168   :  { %v150_v24 = vpop.f32.mrf.mxu0 }
 0x169   :  { %v151_v25 = vadd.f32 %v298_v23, %v150_v24 }
 0x16a   :  { %v312_v26 = vpop.f32.mrf.mxu0 }
 0x16b   :  { %v154_v27 = vmax.f32 %v151_v25, 0.0 }
 0x16d   :  { %316 = vmatmul.mubr.msk.f32.vlgmr.msra.gmra.mxu1 %vm163_vm5, %v154_v27 }
 0x22d   :  { %v237_v29 = vpop.f32.mrf.mxu1 }
 0x22e   :  { %v238_v30 = vadd.f32 %v301_v28, %v237_v29 }
 0x22f   :  { %v317_v31 = vpop.f32.mrf.mxu1 }
 0x230   :  { %v241_v32 = vadd.f32 3.0, %v238_v30 }
 0x232   :  { %v242_v33 = vmax.f32 %v241_v32, 0.0 }
 0x234   :  { %v243_v34 = vmin.f32 %v242_v33, 6.0 }
 0x236   :  { %v244_v36 = vmul.f32 0.16666667, %v243_v34 }
 0x238   :  { %v248_v37 = vrot.slane %v244_v36, %v247_v35  ;;  %v255_v39 = vrot.slane %v244_v36, %v254_v38 }
 0x23a   :  { %250 = vbcast.lane.b32.xlu1 %v248_v37, 256 }
 0x23e   :  { %257 = vbcast.lane.b32.xlu1 %v255_v39, 256 }
 0x2ac   :  { %v251_v44 = vpop.permute.xlu1 %250 }
 0x2ad   :  { %v267_v45 = vrot.slane %v251_v44, %v266_v43 }
 0x2af   :  { %v277_v46 = vmul.f32 %v267_v45, %v37_v1 }
 0x2b0   :  { %v258_v47 = vpop.permute.xlu1 %257 }
 0x2b1   :  { %279 = vst [vmem:[#allocation6] sm:$0xff] %v277_v46  ;;  %v274_v48 = vrot.slane %v258_v47, %v266_v43 }
 0x2b3   :  { %v278_v49 = vmul.f32 %v274_v48, %v417_v2 }
 0x2b5   :  { %280 = vst [vmem:[#allocation6 + $0x8] sm:$0xff] %v278_v49 }
 0x2b6   :  { %358 = shalt.err (!%p355_p9)
}
 0x2b7   :  { %292 = dma.vmem_to_hbm [thread:$0]  %s287_s4, 256, %s448_s5, [#allocation5], %s372_s23, %s372_s23, %s373_s24  }
 0x2b8   :  { %369 = dma.done.wait [#allocation5], 256  }
 0x2b9   :  { %370 = vsyncadd [#allocation5], 4294967040 }
 0x2ba   :  { %296 = vsyncpa [#allocation4], 1 }
 0x2bb   :  { %297 = vsyncpa [#allocation5], 1 }

</bundles_post_ra>
